<compile_context>
chip_gen: v6e
topology: v6e:2x2x1
jax: 0.10.0
libtpu: 0.0.40
codegen_flags: <defaults>
</compile_context>

<pallas_src>
import math
from functools import partial

import jax
import jax.numpy as jnp
from jax.experimental import pallas as pl
from jax.experimental.pallas import tpu as pltpu

_LANE = 128            # vreg lane width
_SUBLANE = 8           # f32 sublanes per vreg
_ROW_BYTES = _LANE * 4
_MAX_BLOCK_ROWS = 1024             # ~86% HBM roofline; safe on every gen
_VMEM_BUDGET_BYTES = 8 * 1024 * 1024   # in+out, double-buffered, all arrays


def _cdiv(a, b):
    return -(-a // b)


def _plan(sizes):
    """Static (trace-time) tiling plan for the lane-dense views.

    Returns (grid, padded_rows, block_rows) with, for every array i:
      padded_rows[i] = block_rows[i] * grid,  block_rows[i] % 8 == 0,
      block_rows[i] <= _MAX_BLOCK_ROWS,
    and (in+out) * 2 buffers * sum(block_rows) * 512 B under the VMEM budget.
    """
    rows = [max(1, _cdiv(_cdiv(n, _LANE), _SUBLANE)) * _SUBLANE for n in sizes]
    g_vmem = _cdiv(4 * sum(rows) * _ROW_BYTES, _VMEM_BUDGET_BYTES)
    g_blk = max(_cdiv(r, _MAX_BLOCK_ROWS) for r in rows)
    grid = max(1, g_vmem, g_blk)
    block_rows = [_cdiv(_cdiv(r, grid), _SUBLANE) * _SUBLANE for r in rows]
    padded_rows = [br * grid for br in block_rows]
    return grid, tuple(padded_rows), tuple(block_rows)


def _lane_dense(a, padded_rows):
    """Lane/sublane-dense (rows, 128) view; free when already tile-aligned."""
    flat = a.reshape(-1)
    pad = padded_rows * _LANE - flat.size
    if pad:
        flat = jnp.pad(flat, (0, pad))
    return flat.reshape(padded_rows, _LANE)


def _undense(o, size, shape):
    flat = o.reshape(-1)
    if flat.size != size:
        flat = flat[:size]
    return flat.reshape(shape)


# ---------------------------------------------------------------------------
# Fused Pallas kernel: scalar accumulator update + elementwise doubling.
# ---------------------------------------------------------------------------
def _mycell_fused_kernel(
    acc_ref,        # SMEM int32 (1,)   : current ctrl_acc (whole, resident)
    ctrl_ref,       # SMEM int32 (1,)   : ctrl increment
    x_ref,          # VMEM f32 (bx,128) : block of lane-dense x
    state_ref,      # VMEM f32 (bs,128) : block of lane-dense state
    cov_ref,        # VMEM f32 (bc,128) : block of lane-dense state_cov
    acc_out_ref,    # SMEM int32 (1,)   : new ctrl_acc (aliased onto acc input)
    x_out_ref,
    state_out_ref,
    cov_out_ref,
):
    # Scalar side effect once per call; the grid-constant SMEM output stays
    # resident across the row grid and is written back after the last step.
    @pl.when(pl.program_id(0) == 0)
    def _():
        acc_out_ref[0] = acc_ref[0] + ctrl_ref[0]

    # Elementwise hot path (pure VPU; weak-typed literal keeps input dtype).
    x_out_ref[...] = x_ref[...] * 2
    state_out_ref[...] = state_ref[...] * 2
    cov_out_ref[...] = cov_ref[...] * 2


_SMEM_SPEC = pl.BlockSpec(memory_space=pltpu.SMEM)


def _mycell_step(ctrl_acc, ctrl, x, state, state_cov):
    """One fused MyCell forward: a single pallas_call over a 1-D row grid."""
    grid, padded_rows, block_rows = _plan((x.size, state.size, state_cov.size))

    x2 = _lane_dense(x, padded_rows[0])
    s2 = _lane_dense(state, padded_rows[1])
    c2 = _lane_dense(state_cov, padded_rows[2])

    def vspec(br):
        return pl.BlockSpec((br, _LANE), lambda i: (i, 0))

    out_shapes = (
        jax.ShapeDtypeStruct(ctrl_acc.shape, ctrl_acc.dtype),
        jax.ShapeDtypeStruct(x2.shape, x2.dtype),
        jax.ShapeDtypeStruct(s2.shape, s2.dtype),
        jax.ShapeDtypeStruct(c2.shape, c2.dtype),
    )

    new_acc, ox, ostate, ocov = pl.pallas_call(
        _mycell_fused_kernel,
        out_shape=out_shapes,
        grid=(grid,),
        in_specs=[
            _SMEM_SPEC,
            _SMEM_SPEC,
            vspec(block_rows[0]),
            vspec(block_rows[1]),
            vspec(block_rows[2]),
        ],
        out_specs=(
            _SMEM_SPEC,
            vspec(block_rows[0]),
            vspec(block_rows[1]),
            vspec(block_rows[2]),
        ),
        # ctrl_acc updated in place (input 0 -> output 0); the jit boundary
        # donates ctrl_acc so XLA does not insert a defensive copy.
        input_output_aliases={0: 0},
        compiler_params=pltpu.CompilerParams(
            dimension_semantics=("arbitrary",),
        ),
    )(ctrl_acc, ctrl, x2, s2, c2)

    return (
        new_acc,
        _undense(ox, x.size, x.shape),
        _undense(ostate, state.size, state.shape),
        _undense(ocov, state_cov.size, state_cov.shape),
    )


# Single step: one jit boundary, ctrl_acc donated so the aliased update is
# genuinely in place.
mycell_forward = jax.jit(_mycell_step, donate_argnums=0)


@partial(jax.jit, donate_argnums=0)
def mycell_forward_steps(ctrl_acc, ctrls, x, state, state_cov):
    """Run T MyCell steps under ONE dispatch (lax.scan over ctrls, shape (T,1)).

    Returns the final accumulator plus the last step's outputs (identical to
    any step's outputs for this module).  This is the shape the surrounding
    UKF time loop should take: per-step dispatch and DMA-setup overhead is
    amortized across the whole trajectory.
    """
    def body(acc, ctrl):
        acc, _, _, _ = _mycell_step(acc, ctrl, x, state, state_cov)
        return acc, None

    acc, _ = jax.lax.scan(body, ctrl_acc, ctrls[:-1])
    return _mycell_step(acc, ctrls[-1], x, state, state_cov)


class MyCell:
    """JAX/Pallas port of the PyTorch MyCell module (stateful ctrl_acc)."""

    def __init__(self):
        # torch.tensor([0], dtype=torch.int) -> int32 accumulator of shape (1,)
        self.ctrl_acc = jnp.zeros((1,), dtype=jnp.int32)

    def __call__(self, x, state, state_cov, ctrl):
        # Accumulator threaded explicitly through the jitted call (single
        # dispatch, donated), then stored back like the nn.Module attribute.
        self.ctrl_acc, ox, ostate, ocov = mycell_forward(
            self.ctrl_acc, ctrl, x, state, state_cov
        )
        return ox, ostate, ocov


# ---------------------------------------------------------------------------
# Demo / smoke test
# ---------------------------------------------------------------------------
if __name__ == "__main__":
    key = jax.random.PRNGKey(0)
    kx, ks, kc = jax.random.split(key, 3)

    B, C, H, W = 2, 4, 16, 16   # x in NCHW
    D = 32                      # state dim

    x = jax.random.normal(kx, (B, C, H, W), dtype=jnp.float32)
    state = jax.random.normal(ks, (B, D), dtype=jnp.float32)
    state_cov = jax.random.normal(kc, (B, D, D), dtype=jnp.float32)
    ctrl = jnp.array([3], dtype=jnp.int32)

    cell = MyCell()
    out_x, out_state, out_cov = cell(x, state, state_cov, ctrl)
    jax.block_until_ready((out_x, out_state, out_cov, cell.ctrl_acc))

    # Correctness checks against the obvious reference.
    assert jnp.allclose(out_x, x * 2)
    assert jnp.allclose(out_state, state * 2)
    assert jnp.allclose(out_cov, state_cov * 2)
    assert out_x.shape == x.shape
    assert out_state.shape == state.shape
    assert out_cov.shape == state_cov.shape
    assert int(cell.ctrl_acc[0]) == 3

    # Second call exercises the stateful accumulator again.
    cell(x, state, state_cov, ctrl)
    jax.block_until_ready(cell.ctrl_acc)
    assert int(cell.ctrl_acc[0]) == 6

    # Amortized multi-step path: 4 MyCell steps under one dispatch.
    ctrls = jnp.arange(1, 5, dtype=jnp.int32).reshape(4, 1)
    acc_T, sx, ss, sc = mycell_forward_steps(
        jnp.zeros((1,), jnp.int32), ctrls, x, state, state_cov
    )
    jax.block_until_ready((acc_T, sx, ss, sc))
    assert int(acc_T[0]) == 10          # 1 + 2 + 3 + 4
    assert jnp.allclose(sx, x * 2)
    assert jnp.allclose(ss, state * 2)
    assert jnp.allclose(sc, state_cov * 2)

    print("KERNEL_OK")
</pallas_src>

<mosaic_0001>
module attributes {stable_mosaic.version = 11 : i64} {
  func.func @_mycell_fused_kernel(%arg0: i32, %arg1: memref<1xi32, #tpu.memory_space<smem>>, %arg2: memref<1xi32, #tpu.memory_space<smem>>, %arg3: memref<16x128xf32, #tpu.memory_space<vmem>>, %arg4: memref<8x128xf32, #tpu.memory_space<vmem>>, %arg5: memref<16x128xf32, #tpu.memory_space<vmem>>, %arg6: memref<1xi32, #tpu.memory_space<smem>>, %arg7: memref<16x128xf32, #tpu.memory_space<vmem>>, %arg8: memref<8x128xf32, #tpu.memory_space<vmem>>, %arg9: memref<16x128xf32, #tpu.memory_space<vmem>>) attributes {dimension_semantics = [#tpu.dimension_semantics<arbitrary>], iteration_bounds = array<i64: 1>, scalar_prefetch = 0 : i64, scratch_operands = 0 : i64, tpu.core_type = #tpu.core_type<tc>, window_params = [{transform_indices = @transform_0, window_bounds = array<i64: 1>}, {transform_indices = @transform_1, window_bounds = array<i64: 1>}, {transform_indices = @transform_2, window_bounds = array<i64: 16, 128>}, {transform_indices = @transform_3, window_bounds = array<i64: 8, 128>}, {transform_indices = @transform_4, window_bounds = array<i64: 16, 128>}, {transform_indices = @transform_5, window_bounds = array<i64: 1>}, {transform_indices = @transform_6, window_bounds = array<i64: 16, 128>}, {transform_indices = @transform_7, window_bounds = array<i64: 8, 128>}, {transform_indices = @transform_8, window_bounds = array<i64: 16, 128>}]} {
    %c0_i32 = arith.constant 0 : i32
    %0 = arith.cmpi eq, %arg0, %c0_i32 : i32
    %1 = arith.extui %0 : i1 to i32
    %c0_i32_0 = arith.constant 0 : i32
    %2 = arith.cmpi ne, %1, %c0_i32_0 : i32
    scf.if %2 {
      %c0_14 = arith.constant 0 : index
      %15 = memref.load %arg1[%c0_14] : memref<1xi32, #tpu.memory_space<smem>>
      %c0_15 = arith.constant 0 : index
      %16 = memref.load %arg2[%c0_15] : memref<1xi32, #tpu.memory_space<smem>>
      %17 = arith.addi %15, %16 : i32
      %c0_16 = arith.constant 0 : index
      %18 = memref.load %arg6[%c0_16] : memref<1xi32, #tpu.memory_space<smem>>
      memref.store %17, %arg6[%c0_16] : memref<1xi32, #tpu.memory_space<smem>>
    } else {
    }
    %c0 = arith.constant 0 : index
    %c0_1 = arith.constant 0 : index
    %3 = vector.load %arg3[%c0, %c0_1] : memref<16x128xf32, #tpu.memory_space<vmem>>, vector<16x128xf32>
    %cst = arith.constant 2.000000e+00 : f32
    %4 = vector.broadcast %cst : f32 to vector<16x128xf32>
    %5 = arith.mulf %3, %4 : vector<16x128xf32>
    %c0_2 = arith.constant 0 : index
    %c0_3 = arith.constant 0 : index
    %6 = vector.load %arg7[%c0_2, %c0_3] : memref<16x128xf32, #tpu.memory_space<vmem>>, vector<16x128xf32>
    tpu.vector_store %arg7[%c0_2, %c0_3], %5 {strides = array<i32>} : memref<16x128xf32, #tpu.memory_space<vmem>>, vector<16x128xf32>,
    %c0_4 = arith.constant 0 : index
    %c0_5 = arith.constant 0 : index
    %7 = vector.load %arg4[%c0_4, %c0_5] : memref<8x128xf32, #tpu.memory_space<vmem>>, vector<8x128xf32>
    %cst_6 = arith.constant 2.000000e+00 : f32
    %8 = vector.broadcast %cst_6 : f32 to vector<8x128xf32>
    %9 = arith.mulf %7, %8 : vector<8x128xf32>
    %c0_7 = arith.constant 0 : index
    %c0_8 = arith.constant 0 : index
    %10 = vector.load %arg8[%c0_7, %c0_8] : memref<8x128xf32, #tpu.memory_space<vmem>>, vector<8x128xf32>
    tpu.vector_store %arg8[%c0_7, %c0_8], %9 {strides = array<i32>} : memref<8x128xf32, #tpu.memory_space<vmem>>, vector<8x128xf32>,
    %c0_9 = arith.constant 0 : index
    %c0_10 = arith.constant 0 : index
    %11 = vector.load %arg5[%c0_9, %c0_10] : memref<16x128xf32, #tpu.memory_space<vmem>>, vector<16x128xf32>
    %cst_11 = arith.constant 2.000000e+00 : f32
    %12 = vector.broadcast %cst_11 : f32 to vector<16x128xf32>
    %13 = arith.mulf %11, %12 : vector<16x128xf32>
    %c0_12 = arith.constant 0 : index
    %c0_13 = arith.constant 0 : index
    %14 = vector.load %arg9[%c0_12, %c0_13] : memref<16x128xf32, #tpu.memory_space<vmem>>, vector<16x128xf32>
    tpu.vector_store %arg9[%c0_12, %c0_13], %13 {strides = array<i32>} : memref<16x128xf32, #tpu.memory_space<vmem>>, vector<16x128xf32>,
    return
  }
  func.func @transform_0(%arg0: i32) -> i32 {
    %c0_i32 = arith.constant 0 : i32
    %c0_i32_0 = arith.constant 0 : i32
    return %c0_i32 : i32
  }
  func.func @transform_1(%arg0: i32) -> i32 {
    %c0_i32 = arith.constant 0 : i32
    %c0_i32_0 = arith.constant 0 : i32
    return %c0_i32 : i32
  }
  func.func @transform_2(%arg0: i32) -> (i32, i32) {
    %c0_i32 = arith.constant 0 : i32
    %c0_i32_0 = arith.constant 0 : i32
    return %arg0, %c0_i32 : i32, i32
  }
  func.func @transform_3(%arg0: i32) -> (i32, i32) {
    %c0_i32 = arith.constant 0 : i32
    %c0_i32_0 = arith.constant 0 : i32
    return %arg0, %c0_i32 : i32, i32
  }
  func.func @transform_4(%arg0: i32) -> (i32, i32) {
    %c0_i32 = arith.constant 0 : i32
    %c0_i32_0 = arith.constant 0 : i32
    return %arg0, %c0_i32 : i32, i32
  }
  func.func @transform_5(%arg0: i32) -> i32 {
    %c0_i32 = arith.constant 0 : i32
    %c0_i32_0 = arith.constant 0 : i32
    return %c0_i32 : i32
  }
  func.func @transform_6(%arg0: i32) -> (i32, i32) {
    %c0_i32 = arith.constant 0 : i32
    %c0_i32_0 = arith.constant 0 : i32
    return %arg0, %c0_i32 : i32, i32
  }
  func.func @transform_7(%arg0: i32) -> (i32, i32) {
    %c0_i32 = arith.constant 0 : i32
    %c0_i32_0 = arith.constant 0 : i32
    return %arg0, %c0_i32 : i32, i32
  }
  func.func @transform_8(%arg0: i32) -> (i32, i32) {
    %c0_i32 = arith.constant 0 : i32
    %c0_i32_0 = arith.constant 0 : i32
    return %arg0, %c0_i32 : i32, i32
  }
}

</mosaic_0001>

<bundles_post_ra>
// kernel: _mycell_step.1
= control target key start
LH: loop header
LB: loop body
LE: loop exit
PB: predicated region body
PF: predicated region fallthrough
CT: control target
= control target key end

     0   :  { %s172_s0 = inlined_call_operand.<no memory space> [shape: s32[1], index: 0, kind: input, shape index: {}, may-alias: {0,5}]   ;;  %s173_s1 = inlined_call_operand.<no memory space> [shape: s32[1], index: 1, kind: input, shape index: {}]   ;;  %s174_s2 = inlined_call_operand.vmem [shape: f32[16,128], index: 2, kind: input, shape index: {}]   ;;  %s175_s3 = inlined_call_operand.vmem [shape: f32[8,128], index: 3, kind: input, shape index: {}]   ;;  %s176_s4 = inlined_call_operand.vmem [shape: f32[16,128], index: 4, kind: input, shape index: {}]   ;;  %s177_s5 = inlined_call_operand.hbm [shape: s32[1], index: 5, kind: output, shape index: {0}, may-alias: {0,5}]   ;;  %s178_s6 = inlined_call_operand.vmem [shape: f32[16,128], index: 6, kind: output, shape index: {1}]   ;;  %s179_s7 = inlined_call_operand.vmem [shape: f32[8,128], index: 7, kind: output, shape index: {2}]   ;;  %s180_s8 = inlined_call_operand.vmem [shape: f32[16,128], index: 8, kind: output, shape index: {3}]  }
   0x1   :  { %v36_v0 = vld [vmem:[%s174_s2] sm:$0xff]  ;;  %v37_v1 = vld [vmem:[%s174_s2 + $0x8] sm:$0xff]  ;;  %s33_s15 = sadd.s32 %s173_s1, %s172_s0 }
   0x2   :  { %v42_v2 = vld [vmem:[%s175_s3] sm:$0xff]  ;;  %v38_v3 = vmul.f32 2.0, %v36_v0  ;;  %v39_v4 = vmul.f32 2.0, %v37_v1  ;;  %v46_v7 = vld [vmem:[%s176_s4 + $0x8] sm:$0xff]  ;;  %35 = sst [smem:[#allocation4]] %s33_s15 }
   0x3   :  { %v43_v5 = vmul.f32 2.0, %v42_v2  ;;  %v45_v6 = vld [vmem:[%s176_s4] sm:$0xff]  ;;  %v48_v9 = vmul.f32 2.0, %v46_v7 }
   0x4   :  { %v47_v8 = vmul.f32 2.0, %v45_v6 }
   0x5   :  { %16 = vsyncpa [#allocation5], 0  ;;  %40 = vst [vmem:[%s178_s6] sm:$0xff] %v38_v3  ;;  %s87_s22 = smov [#allocation4]  }
   0x6   :  { %41 = vst [vmem:[%s178_s6 + $0x8] sm:$0xff] %v39_v4  ;;  %44 = vst [vmem:[%s179_s7] sm:$0xff] %v43_v5  ;;  %58 = dma.smem_to_hbm %s87_s22, 16, %s177_s5, [#allocation5]  }
   0x7   :  { %49 = vst [vmem:[%s180_s8] sm:$0xff] %v47_v8  ;;  %50 = vst [vmem:[%s180_s8 + $0x8] sm:$0xff] %v48_v9 }
   0x8   :  { %85 = dma.done.wait [#allocation5], 16  }
   0x9   :  { %86 = vsyncadd [#allocation5], 4294967280 }
   0xa   :  { %74 = sfence }
   0xb   :  { %75 = vsyncpa [#allocation5], 1 }

</bundles_post_ra>
